<compile_context>
chip_gen: v6e
topology: v6e:2x2x1
jax: 0.10.0
libtpu: 0.0.40
codegen_flags: <defaults>
</compile_context>

<pallas_src>
import math

import jax
import jax.numpy as jnp
from jax.experimental import pallas as pl
from jax.experimental.pallas import tpu as pltpu


def _round_up(x, m):
    return (x + m - 1) // m * m


def _make_kernel(conv_clamp):
    def torgb_kernel(modw_ref, b_ref, x_ref, o_ref):
        # modw_ref: [1, C_out, C_in]   (per-sample modulated 1x1 conv weight)
        # x_ref   : [1, C_in, THW]     (lane-dense on HW)
        # b_ref   : [C_out, 1]
        # o_ref   : [1, C_out, THW]
        y = jnp.dot(modw_ref[0], x_ref[0],
                    preferred_element_type=jnp.float32)     # [C_out, THW]
        y = y + b_ref[...]                                   # bias_act (linear)
        if conv_clamp is not None:
            y = jnp.clip(y, -conv_clamp, conv_clamp)
        o_ref[0] = y.astype(o_ref.dtype)

    return torgb_kernel


def to_rgb_layer(x_nchw, w, params, *, conv_clamp=None):
    """Forward pass of ToRGBLayer.

    x_nchw : [N, C_in, H, W] float32
    w      : [N, w_dim]      float32
    params : dict with 'affine_weight' [C_in, w_dim], 'affine_bias' [C_in],
             'weight' [C_out, C_in, 1, 1], 'bias' [C_out]
    returns [N, C_out, H, W] float32
    """
    N, C_in, H, W = x_nchw.shape
    w_dim = w.shape[1]
    C_out = params["weight"].shape[0]
    HW = H * W

    affine_gain = 1.0 / math.sqrt(w_dim)          # FullyConnectedLayer gain (lr_mult=1)
    weight_gain = 1.0 / math.sqrt(C_in * 1 * 1)   # ToRGBLayer weight_gain (kernel_size=1)

    # ---- hoisted affine + modulation (tiny; plain XLA) ----------------------
    styles = (w @ params["affine_weight"].T) * affine_gain \
        + params["affine_bias"][None, :]                       # [N, C_in]
    styles = styles * weight_gain
    weight2d = params["weight"].reshape(C_out, C_in)
    modw = weight2d[None, :, :] * styles[:, None, :]           # [N, C_out, C_in]
    modw = modw.astype(jnp.float32)
    bias2d = params["bias"].reshape(C_out, 1).astype(jnp.float32)

    # ---- layout: pure reshape NCHW -> [N, C_in, HW] (HW is the lane dim) ----
    x_flat = x_nchw.reshape(N, C_in, HW)

    # ---- HW tiling: multiple of 128, sized for v7x's 64 MiB VMEM ------------
    vmem_block_budget = 6 * 1024 * 1024  # bytes per (in+out) block, pre double-buffering
    thw_cap = max(128, (vmem_block_budget // (4 * (C_in + C_out))) // 128 * 128)
    THW = min(thw_cap, _round_up(HW, 128))
    HW_pad = _round_up(HW, THW)
    if HW_pad != HW:
        x_flat = jnp.pad(x_flat, ((0, 0), (0, 0), (0, HW_pad - HW)))
    n_hw_tiles = HW_pad // THW

    kernel = _make_kernel(conv_clamp)

    cost = pl.CostEstimate(
        flops=2 * N * HW_pad * C_in * C_out,
        transcendentals=0,
        bytes_accessed=4 * N * HW_pad * (C_in + C_out) + 4 * N * C_out * C_in,
    )

    out_flat = pl.pallas_call(
        kernel,
        out_shape=jax.ShapeDtypeStruct((N, C_out, HW_pad), jnp.float32),
        grid=(N, n_hw_tiles),
        in_specs=[
            pl.BlockSpec((1, C_out, C_in), lambda n, t: (n, 0, 0)),   # modw (per sample)
            pl.BlockSpec((C_out, 1),       lambda n, t: (0, 0)),      # conv bias
            pl.BlockSpec((1, C_in, THW),   lambda n, t: (n, 0, t)),   # x tile
        ],
        out_specs=pl.BlockSpec((1, C_out, THW), lambda n, t: (n, 0, t)),
        compiler_params=pltpu.CompilerParams(
            dimension_semantics=("parallel", "parallel"),
            vmem_limit_bytes=48 * 1024 * 1024,
        ),
        cost_estimate=cost,
    )(modw, bias2d, x_flat)

    if HW_pad != HW:
        out_flat = out_flat[:, :, :HW]
    return out_flat.reshape(N, C_out, H, W)


def _reference(x_nchw, w, params, conv_clamp=None):
    N, C_in, H, W = x_nchw.shape
    w_dim = w.shape[1]
    C_out = params["weight"].shape[0]
    styles = (w @ params["affine_weight"].T) / math.sqrt(w_dim) + params["affine_bias"][None]
    styles = styles * (1.0 / math.sqrt(C_in))
    weight2d = params["weight"].reshape(C_out, C_in)
    modw = weight2d[None] * styles[:, None, :]                 # [N, C_out, C_in]
    out = jnp.einsum("nihw,noi->nohw", x_nchw, modw)
    out = out + params["bias"][None, :, None, None]
    if conv_clamp is not None:
        out = jnp.clip(out, -conv_clamp, conv_clamp)
    return out


if __name__ == "__main__":
    # Small shapes consistent with the module.
    N, C_in, C_out, w_dim, H, W = 2, 8, 3, 16, 16, 16

    key = jax.random.PRNGKey(0)
    k1, k2, k3, k4 = jax.random.split(key, 4)

    # Deterministic synthetic parameters (matching torch init distributions):
    params = {
        # FullyConnectedLayer(w_dim, in_channels, bias_init=1)
        "affine_weight": jax.random.normal(k1, (C_in, w_dim), jnp.float32),
        "affine_bias": jnp.ones((C_in,), jnp.float32),
        # torch.randn([out_channels, in_channels, 1, 1])
        "weight": jax.random.normal(k2, (C_out, C_in, 1, 1), jnp.float32),
        # torch.zeros([out_channels])
        "bias": jnp.zeros((C_out,), jnp.float32),
    }

    x = jax.random.normal(k3, (N, C_in, H, W), jnp.float32)
    wvec = jax.random.normal(k4, (N, w_dim), jnp.float32)

    out = to_rgb_layer(x, wvec, params, conv_clamp=None)
    out = jax.block_until_ready(out)

    ref = _reference(x, wvec, params, conv_clamp=None)
    assert out.shape == (N, C_out, H, W)
    assert jnp.allclose(out, ref, atol=1e-4, rtol=1e-4), "mismatch vs reference"

    # Also exercise the clamp path once (conv_clamp=0.5).
    out_c = jax.block_until_ready(to_rgb_layer(x, wvec, params, conv_clamp=0.5))
    ref_c = _reference(x, wvec, params, conv_clamp=0.5)
    assert jnp.allclose(out_c, ref_c, atol=1e-4, rtol=1e-4), "mismatch vs clamped reference"

    print("KERNEL_OK")
</pallas_src>

<mosaic_0001>
module attributes {stable_mosaic.version = 11 : i64} {
  func.func @torgb_kernel(%arg0: i32, %arg1: i32, %arg2: memref<1x3x8xf32, #tpu.memory_space<vmem>>, %arg3: memref<3x1xf32, #tpu.memory_space<vmem>>, %arg4: memref<1x8x256xf32, #tpu.memory_space<vmem>>, %arg5: memref<1x3x256xf32, #tpu.memory_space<vmem>>) attributes {dimension_semantics = [#tpu.dimension_semantics<parallel>, #tpu.dimension_semantics<parallel>], iteration_bounds = array<i64: 2, 1>, scalar_prefetch = 0 : i64, scratch_operands = 0 : i64, tpu.core_type = #tpu.core_type<tc>, window_params = [{transform_indices = @transform_0, window_bounds = array<i64: 1, 3, 8>}, {pipeline_mode = #tpu.pipeline_mode<synchronous>, transform_indices = @transform_1, window_bounds = array<i64: 3, 1>}, {transform_indices = @transform_2, window_bounds = array<i64: 1, 8, 256>}, {transform_indices = @transform_3, window_bounds = array<i64: 1, 3, 256>}]} {
    %c0 = arith.constant 0 : index
    %c0_0 = arith.constant 0 : index
    %c0_1 = arith.constant 0 : index
    %0 = vector.load %arg2[%c0, %c0_0, %c0_1] : memref<1x3x8xf32, #tpu.memory_space<vmem>>, vector<1x3x8xf32>
    %1 = vector.shape_cast %0 : vector<1x3x8xf32> to vector<3x8xf32>
    %c0_2 = arith.constant 0 : index
    %c0_3 = arith.constant 0 : index
    %c0_4 = arith.constant 0 : index
    %2 = vector.load %arg4[%c0_2, %c0_3, %c0_4] : memref<1x8x256xf32, #tpu.memory_space<vmem>>, vector<1x8x256xf32>
    %3 = vector.shape_cast %2 : vector<1x8x256xf32> to vector<8x256xf32>
    %cst = arith.constant dense<0.000000e+00> : vector<3x256xf32>
    %4 = tpu.matmul %1, %3, %cst {dimension_numbers = #tpu.dot_dimension_numbers<[1], [0], [0], [1], [0, 0, 1, 1], [], []>} : vector<3x8xf32>, vector<8x256xf32>, vector<3x256xf32> -> vector<3x256xf32>
    %c0_5 = arith.constant 0 : index
    %c0_6 = arith.constant 0 : index
    %5 = vector.load %arg3[%c0_5, %c0_6] : memref<3x1xf32, #tpu.memory_space<vmem>>, vector<3x1xf32>
    %6 = vector.broadcast %5 : vector<3x1xf32> to vector<3x256xf32>
    %7 = arith.addf %4, %6 : vector<3x256xf32>
    %c0_7 = arith.constant 0 : index
    %c0_8 = arith.constant 0 : index
    %c0_9 = arith.constant 0 : index
    %8 = vector.load %arg5[%c0_7, %c0_8, %c0_9] : memref<1x3x256xf32, #tpu.memory_space<vmem>>, vector<1x3x256xf32>
    %9 = vector.shape_cast %8 : vector<1x3x256xf32> to vector<3x256xf32>
    %10 = vector.shape_cast %7 : vector<3x256xf32> to vector<1x3x256xf32>
    tpu.vector_store %arg5[%c0_7, %c0_8, %c0_9], %10 {strides = array<i32>} : memref<1x3x256xf32, #tpu.memory_space<vmem>>, vector<1x3x256xf32>,
    return
  }
  func.func @transform_0(%arg0: i32, %arg1: i32) -> (i32, i32, i32) {
    %c0_i32 = arith.constant 0 : i32
    %c0_i32_0 = arith.constant 0 : i32
    %c0_i32_1 = arith.constant 0 : i32
    return %arg0, %c0_i32, %c0_i32_0 : i32, i32, i32
  }
  func.func @transform_1(%arg0: i32, %arg1: i32) -> (i32, i32) {
    %c0_i32 = arith.constant 0 : i32
    %c0_i32_0 = arith.constant 0 : i32
    %c0_i32_1 = arith.constant 0 : i32
    return %c0_i32, %c0_i32_0 : i32, i32
  }
  func.func @transform_2(%arg0: i32, %arg1: i32) -> (i32, i32, i32) {
    %c0_i32 = arith.constant 0 : i32
    %c0_i32_0 = arith.constant 0 : i32
    return %arg0, %c0_i32, %arg1 : i32, i32, i32
  }
  func.func @transform_3(%arg0: i32, %arg1: i32) -> (i32, i32, i32) {
    %c0_i32 = arith.constant 0 : i32
    %c0_i32_0 = arith.constant 0 : i32
    return %arg0, %c0_i32, %arg1 : i32, i32, i32
  }
}

</mosaic_0001>

<bundles_post_ra>
// kernel: tpu_custom_call.1
= control target key start
LH: loop header
LB: loop body
LE: loop exit
PB: predicated region body
PF: predicated region fallthrough
CT: control target
= control target key end

     0   :  { %8 = vsyncpa [#allocation3], 0  ;;  %s714_s0 = inlined_call_operand.vmem [shape: f32[2,3,8], index: 0, kind: input, shape index: {}]   ;;  %s715_s1 = inlined_call_operand.vmem [shape: f32[3,1], index: 1, kind: input, shape index: {}]   ;;  %s716_s2 = inlined_call_operand.hbm [shape: f32[2,8,256], index: 2, kind: input, shape index: {}]   ;;  %s717_s3 = inlined_call_operand.vmem [shape: f32[2,3,256], index: 3, kind: output, shape index: {}]  }
   0x1   :  { %10 = vsyncpa [#allocation3 + $0x1], 0  ;;  %s608_s12 = smov 0   ;;  %s610_s13 = smov 0  }
   0x2   :  { %s612_s14 = smov 0   ;;  %s614_s15 = smov 0  }
   0x3   :  { %s616_s16 = smov 0   ;;  %s618_s17 = smov 0  }
   0x4 LB: > { %s430_s18 = sadd.s32 4294967295, %s583_s17   ;;  %s28_s19 = sadd.s32 1, %s579_s16  ;;  %s583_s17 = sphi %s618_s17, %s16_s17   ;;  %s579_s16 = sphi %s616_s16, %s725_s16   ;;  %s575_s15 = sphi %s614_s15, %s724_s15   ;;  %s571_s14 = sphi %s612_s14, %s723_s14   ;;  %s567_s13 = sphi %s610_s13, %s722_s13   ;;  %s563_s12 = sphi %s608_s12, %s721_s12  }
   0x5   : > { %p30_p0 = scmp.ge.s32.totalorder %s28_s19, 2  ;;  %s84_s20 = sadd.s32 1, %s571_s14 }
   0x6   : > { %p91_p1 = scmp.ne.s32.totalorder %s571_s14, %s567_s13  ;;  %p92_p2 = scmp.eq.s32.totalorder %s583_s17, 0 }
   0x7   : > { %s727_s19 = smov (%p30_p0, %s28_s19), 0  ;;  %p97_p4 = scmp.ne.s32.totalorder %s567_s13, %s563_s12 }
   0x8   : > { %p644_p3 = por %p92_p2, %p91_p1  ;;  %s79_s22 = ssub.s32 %s579_s16, %s727_s19 }
   0x9   : > { %p98_p5 = scmp.eq.s32.totalorder %s430_s18, 0  ;;  %p82_p6 = scmp.eq.s32.totalorder %s79_s22, 0 }
   0xa   : > { %p453_p8 = scmp.lt.s32.totalorder %s583_s17, 2  ;;  %s159_s25 = sand.u32 1, %s571_s14  }
   0xb   : > { %p651_p7 = por %p98_p5, %p97_p4  ;;  %s445_s26 = sshll.u32 %s579_s16, 8 }
   0xc   : > { %s657_s24 = scalar_select %p82_p6, %s571_s14, %s84_s20  }
   0xd   : > { %s434_s27 = sshll.u32 %s159_s25, 4  ;;  %s171_s30 = scalar_lea.hbm %s716_s2, %s445_s26 }
   0xe   : > { %s163_s4 = scalar_lea.vmem [#allocation2], %s434_s27  ;;  %p666_p9 = pnand %p453_p8, %p644_p3 }
   0xf   : > { %s173_s5 = sshll.u32 %s163_s4, 4  ;;  %p437_p10 = scmp.ge.s32.totalorder %s583_s17, 1  ;;  %s174_s5 = int_to_ptr.vmem [resolvable:$true] %s173_s5 }
  0x10   : > { %p178_p11 = scmp.lt.s32.totalorder %s583_s17, 3  ;;  %s160_s7 = scalar_lea.sflag [#allocation3], %s159_s25 }
  0x11   : > { %p507_p12 = pneg %p666_p9  ;;  %s518_s8 = scalar_lea.vmem %s174_s5, 256 }
  0x12   : > { %p519_p13 = scmp.ne.s32.totalorder %s174_s5, %s518_s8  ;;  %s585_s9 = smov [#allocation2]  }
  0x13   : > { %s523_s10 = sshll.u32 %s585_s9, 4  ;;  %s524_s10 = int_to_ptr.vmem [resolvable:$false] %s523_s10 }
  0x14   : > { %p521_p0 = pnand %p519_p13, %p507_p12  ;;  %s525_s11 = scalar_lea.vmem %s524_s10, 512 }
  0x15   : > { %p526_p2 = scmp.lt.s32.totalorder %s174_s5, %s524_s10  ;;  %p527_p3 = scmp.lt.s32.totalorder %s525_s11, %s518_s8 }
  0x16   : > { %p522_p1 = pneg %p521_p0 }
  0x17   : > { %p528_p4 = por %p527_p3, %p526_p2 }
  0x19   : > { %p529_p5 = pnand %p528_p4, %p522_p1 }
  0x1b   : > { %532 = shalt.err (!%p529_p5)
}
  0x1c   : > { %452 = dma.hbm_to_vmem [thread:$0]  (!%p666_p9), %s171_s30, 256, %s174_s5, %s160_s7  }
  0x1d   : > { %p179_p6 = pnand %p437_p10, %p178_p11 }
  0x1e   : > { %s184_s12 = sand.u32 (!%p179_p6), 1, %s567_s13  }
  0x1f   : > { %182 = sbr.rel (%p179_p6) target bundleno = 243 (0xf3), region = 32  ;;  %s438_s18 = sshll.u32 (!%p179_p6), %s184_s12, 4 }
  0x20   : > { %s185_s20 = scalar_lea.sflag (!%p179_p6), [#allocation3], %s184_s12  ;;  %s188_s21 = scalar_lea.vmem (!%p179_p6), [#allocation2], %s438_s18 }
  0x24   : > { %558 = dma.done.wait (%p651_p7), %s185_s20, 256  }
  0x25   : > { %560 = vsyncadd (%p651_p7), %s185_s20, 4294967040  ;;  %p219_p8 = scmp.lt.s32.totalorder %s575_s15, 1  ;;  %v586_v0 = vmov 0.0   ;;  %v587_v1 = vmov 0   ;;  %v236_v2 = vld [vmem:[%s188_s21 + $0x8] sm:$0xff]  ;;  %v235_v3 = vld [vmem:[%s188_s21] sm:$0xff] }
  0x26   : > { %311 = vmatprep.mubr.f32.mxu0 %v586_v0  ;;  %504 = vset.pattern.permute.xlu0 %v587_v1  ;;  %vm243_vm0 = vcmask 64512   ;;  %v237_v5 = vld [vmem:[%s715_s1] sm:$0x7] }
  0x27   : > { %s729_s15 = smov (!%p219_p8, %s575_s15), 1  ;;  %277 = vmatprep.subr.mxu0 %v236_v2  ;;  %240 = vperm.xlu0 %504, %v237_v5  }
  0x28   : > { %s439_s22 = sshll.u32 %s729_s15, 2  ;;  %278 = vmatpush1.msra.mxu0 %v235_v3  ;;  %s446_s29 = sshll.u32 %s729_s15, 3 }
  0x29   : > { %s222_s27 = scalar_lea.vmem %s714_s0, %s439_s22  ;;  %s232_s5 = scalar_lea.vmem %s717_s3, %s446_s29 }
  0x2a   : > { %v234_v4 = vld [vmem:[%s222_s27] sm:$0x7] }
  0x2b   : > { %442 = vmatmul.mubr.msk.f32.vlgmr.msra.gmra.mxu0 %vm243_vm0, %v234_v4 }
  0xa2   : > { %v241_v6 = vpop.permute.xlu0 %240 }
  0xeb   : > { %v313_v7 = vpop.f32.mrf.mxu0 }
  0xec   : > { %v314_v9 = vadd.f32 %v313_v7, %v241_v6 }
  0xed   : > { %v315_v8 = vpop.f32.mrf.mxu0 }
  0xee   : > { %v316_v10 = vadd.f32 %v315_v8, %v241_v6 }
  0xf0   : > { %v320_v11 = vcombine.low %v314_v9, %v316_v10 }
  0xf2   : > { %322 = vst [vmem:[%s232_s5] sm:$0x77] %v320_v11 }
  0xf3 PF: > { %s16_s17 = sadd.s32 1, %s583_s17   ;;  %s721_s12 = smov %s567_s13 }
  0xf4   : > { %p13_p7 = scmp.ge.s32.totalorder %s16_s17, 4   ;;  %s722_s13 = smov %s571_s14 }
  0xf5   : > { %s723_s14 = smov %s657_s24  ;;  %s724_s15 = smov %s579_s16 }
  0xf6   : > { %s725_s16 = smov %s727_s19  ;;  %15 = sbr.rel (!%p13_p7) target bundleno = 4 (0x4), region = 75 }
  0xfb   :  { %353 = vsyncpa [#allocation3], 1 }
  0xfc   :  { %355 = vsyncpa [#allocation3 + $0x1], 1 }

</bundles_post_ra>
